<compile_context>
chip_gen: v6e
topology: v6e:2x2x1
jax: 0.10.0
libtpu: 0.0.40
codegen_flags: <defaults>
</compile_context>

<pallas_src>
import jax
import jax.numpy as jnp
from jax.experimental import pallas as pl
from jax.experimental.pallas import tpu as pltpu


def _fno_kernel(xr_ref, xi_ref, w_ref, or_ref, oi_ref):
    # xr_ref / xi_ref: (F, B, d_in)   f32
    # w_ref:           (F, 2*d_in, 2*d_out)  bf16  (stacked complex weight)
    # or_ref / oi_ref: (F, B, d_out)  f32
    f_modes = w_ref.shape[0]
    d_out = or_ref.shape[-1]
    for f in range(f_modes):  # F is tiny & static: full unroll, leading-dim indexing
        x_ri = jnp.concatenate([xr_ref[f], xi_ref[f]], axis=-1).astype(jnp.bfloat16)
        out = jnp.dot(x_ri, w_ref[f], preferred_element_type=jnp.float32)  # (B, 2*d_out)
        or_ref[f] = out[:, :d_out]
        oi_ref[f] = out[:, d_out:]


def prepare_fno_weight(w_complex, dtype=jnp.bfloat16):
    """Build the stacked real weight ONCE at parameter-init time (not per call).

    w_complex: (F, d_in, d_out) complex64
    returns  : (F, 2*d_in, 2*d_out) `dtype`, laid out as [[wr, wi], [-wi, wr]]
    so that  [xr | xi] @ w_ri = [real | imag].
    """
    wr = jnp.real(w_complex).astype(jnp.float32)
    wi = jnp.imag(w_complex).astype(jnp.float32)
    w_top = jnp.concatenate([wr, wi], axis=-1)      # (F, d_in, 2*d_out)
    w_bot = jnp.concatenate([-wi, wr], axis=-1)     # (F, d_in, 2*d_out)
    return jnp.concatenate([w_top, w_bot], axis=-2).astype(dtype)


def fno_forward(x_complex, w_ri):
    """x_complex: (B, F, d_in) complex64; w_ri: stacked weight from prepare_fno_weight.
    Returns (out, None, None), out: (B, F, d_out) complex64 — matches FNO.forward
    (mode_=1) semantics."""
    B, F, d_in = x_complex.shape
    Fw, two_d_in, two_d_out = w_ri.shape
    d_out = two_d_out // 2
    assert F == Fw and two_d_in == 2 * d_in

    # F-leading layout so in-kernel per-mode access is leading-dim indexing.
    # These transposes touch <=16 KB and are essentially free.
    xr_t = jnp.transpose(jnp.real(x_complex), (1, 0, 2)).astype(jnp.float32)
    xi_t = jnp.transpose(jnp.imag(x_complex), (1, 0, 2)).astype(jnp.float32)

    vmem = pl.BlockSpec(memory_space=pltpu.MemorySpace.VMEM)
    cost = pl.CostEstimate(
        flops=2 * B * F * two_d_in * two_d_out,
        transcendentals=0,
        bytes_accessed=(2 * B * F * d_in * 4          # xr, xi (f32)
                        + F * two_d_in * two_d_out * 2  # w_ri (bf16)
                        + 2 * B * F * d_out * 4),       # out_r, out_i (f32)
    )

    out_r, out_i = pl.pallas_call(
        _fno_kernel,
        out_shape=(jax.ShapeDtypeStruct((F, B, d_out), jnp.float32),
                   jax.ShapeDtypeStruct((F, B, d_out), jnp.float32)),
        in_specs=[vmem, vmem, vmem],
        out_specs=(vmem, vmem),
        compiler_params=pltpu.CompilerParams(vmem_limit_bytes=8 * 1024 * 1024),
        cost_estimate=cost,
    )(xr_t, xi_t, w_ri)

    out = jnp.transpose(jax.lax.complex(out_r, out_i), (1, 0, 2))  # (B, F, d_out)
    return out, None, None


def _trunc_normal(key, shape, std=0.04, a=-0.2, b=0.2):
    # deterministic trunc_normal_(mean=0, std=std, a=a, b=b) equivalent
    lo, hi = a / std, b / std
    return std * jax.random.truncated_normal(key, lo, hi, shape, dtype=jnp.float32)


if __name__ == "__main__":
    # Small shapes consistent with the module: B=2, f_modes=8, hidden_in=32, hidden_out=128
    B, F_modes, hidden_in, hidden_out = 2, 8, 32, 128

    key = jax.random.PRNGKey(0)
    k_xr, k_xi, k_wr, k_wi = jax.random.split(key, 4)

    # deterministic parameter init (FNO complex weight, mode_=1)
    w_real = _trunc_normal(k_wr, (F_modes, hidden_in, hidden_out))
    w_imag = _trunc_normal(k_wi, (F_modes, hidden_in, hidden_out))
    w_complex = jax.lax.complex(w_real, w_imag)

    # Hoisted parameter prep: stacked bf16 weight built ONCE, outside the forward.
    w_ri = jax.block_until_ready(prepare_fno_weight(w_complex))

    # deterministic complex "frequency representation" input
    x_real = jax.random.normal(k_xr, (B, F_modes, hidden_in), dtype=jnp.float32)
    x_imag = jax.random.normal(k_xi, (B, F_modes, hidden_in), dtype=jnp.float32)
    x_complex = jax.lax.complex(x_real, x_imag)

    fwd = jax.jit(fno_forward)
    out, _, _ = fwd(x_complex, w_ri)
    out = jax.block_until_ready(out)

    # reference check (pure JAX einsum on complex arrays); loose tolerance due to
    # bf16 matmul inputs (f32 accumulation).
    ref = jnp.einsum('bfi,fio->bfo', x_complex, w_complex)
    assert out.shape == (B, F_modes, hidden_out)
    assert out.dtype == jnp.complex64
    max_err = float(jnp.max(jnp.abs(out - ref)))
    assert jnp.allclose(out, ref, atol=2e-2, rtol=2e-2), max_err

    print("KERNEL_OK")
</pallas_src>

<mosaic_0001>
module attributes {stable_mosaic.version = 11 : i64} {
  func.func @_fno_kernel(%arg0: memref<8x2x32xf32, #tpu.memory_space<vmem>>, %arg1: memref<8x2x32xf32, #tpu.memory_space<vmem>>, %arg2: memref<8x64x256xbf16, #tpu.memory_space<vmem>>, %arg3: memref<8x2x128xf32, #tpu.memory_space<vmem>>, %arg4: memref<8x2x128xf32, #tpu.memory_space<vmem>>) attributes {dimension_semantics = [], scalar_prefetch = 0 : i64, scratch_operands = 0 : i64, tpu.core_type = #tpu.core_type<tc>} {
    %c0 = arith.constant 0 : index
    %c0_0 = arith.constant 0 : index
    %c0_1 = arith.constant 0 : index
    %0 = vector.load %arg0[%c0, %c0_0, %c0_1] : memref<8x2x32xf32, #tpu.memory_space<vmem>>, vector<1x2x32xf32>
    %1 = vector.shape_cast %0 : vector<1x2x32xf32> to vector<2x32xf32>
    %c0_2 = arith.constant 0 : index
    %c0_3 = arith.constant 0 : index
    %c0_4 = arith.constant 0 : index
    %2 = vector.load %arg1[%c0_2, %c0_3, %c0_4] : memref<8x2x32xf32, #tpu.memory_space<vmem>>, vector<1x2x32xf32>
    %3 = vector.shape_cast %2 : vector<1x2x32xf32> to vector<2x32xf32>
    %4 = tpu.concatenate %1, %3 in 1 : vector<2x32xf32>, vector<2x32xf32> -> vector<2x64xf32>
    %5 = arith.truncf %4 : vector<2x64xf32> to vector<2x64xbf16>
    %c0_5 = arith.constant 0 : index
    %c0_6 = arith.constant 0 : index
    %c0_7 = arith.constant 0 : index
    %6 = vector.load %arg2[%c0_5, %c0_6, %c0_7] : memref<8x64x256xbf16, #tpu.memory_space<vmem>>, vector<1x64x256xbf16>
    %7 = vector.shape_cast %6 : vector<1x64x256xbf16> to vector<64x256xbf16>
    %cst = arith.constant dense<0.000000e+00> : vector<2x256xf32>
    %8 = tpu.matmul %5, %7, %cst {dimension_numbers = #tpu.dot_dimension_numbers<[1], [0], [0], [1], [0, 0, 1, 1], [], []>} : vector<2x64xbf16>, vector<64x256xbf16>, vector<2x256xf32> -> vector<2x256xf32>
    %9 = vector.extract_strided_slice %8 {offsets = [0, 0], sizes = [2, 128], strides = [1, 1]} : vector<2x256xf32> to vector<2x128xf32>
    %c0_8 = arith.constant 0 : index
    %c0_9 = arith.constant 0 : index
    %c0_10 = arith.constant 0 : index
    %10 = vector.load %arg3[%c0_8, %c0_9, %c0_10] : memref<8x2x128xf32, #tpu.memory_space<vmem>>, vector<1x2x128xf32>
    %11 = vector.shape_cast %10 : vector<1x2x128xf32> to vector<2x128xf32>
    %12 = vector.shape_cast %9 : vector<2x128xf32> to vector<1x2x128xf32>
    tpu.vector_store %arg3[%c0_8, %c0_9, %c0_10], %12 {strides = array<i32>} : memref<8x2x128xf32, #tpu.memory_space<vmem>>, vector<1x2x128xf32>,
    %13 = vector.extract_strided_slice %8 {offsets = [0, 128], sizes = [2, 128], strides = [1, 1]} : vector<2x256xf32> to vector<2x128xf32>
    %c0_11 = arith.constant 0 : index
    %c0_12 = arith.constant 0 : index
    %c0_13 = arith.constant 0 : index
    %14 = vector.load %arg4[%c0_11, %c0_12, %c0_13] : memref<8x2x128xf32, #tpu.memory_space<vmem>>, vector<1x2x128xf32>
    %15 = vector.shape_cast %14 : vector<1x2x128xf32> to vector<2x128xf32>
    %16 = vector.shape_cast %13 : vector<2x128xf32> to vector<1x2x128xf32>
    tpu.vector_store %arg4[%c0_11, %c0_12, %c0_13], %16 {strides = array<i32>} : memref<8x2x128xf32, #tpu.memory_space<vmem>>, vector<1x2x128xf32>,
    %c1 = arith.constant 1 : index
    %c0_14 = arith.constant 0 : index
    %c0_15 = arith.constant 0 : index
    %17 = vector.load %arg0[%c1, %c0_14, %c0_15] : memref<8x2x32xf32, #tpu.memory_space<vmem>>, vector<1x2x32xf32>
    %18 = vector.shape_cast %17 : vector<1x2x32xf32> to vector<2x32xf32>
    %c1_16 = arith.constant 1 : index
    %c0_17 = arith.constant 0 : index
    %c0_18 = arith.constant 0 : index
    %19 = vector.load %arg1[%c1_16, %c0_17, %c0_18] : memref<8x2x32xf32, #tpu.memory_space<vmem>>, vector<1x2x32xf32>
    %20 = vector.shape_cast %19 : vector<1x2x32xf32> to vector<2x32xf32>
    %21 = tpu.concatenate %18, %20 in 1 : vector<2x32xf32>, vector<2x32xf32> -> vector<2x64xf32>
    %22 = arith.truncf %21 : vector<2x64xf32> to vector<2x64xbf16>
    %c1_19 = arith.constant 1 : index
    %c0_20 = arith.constant 0 : index
    %c0_21 = arith.constant 0 : index
    %23 = vector.load %arg2[%c1_19, %c0_20, %c0_21] : memref<8x64x256xbf16, #tpu.memory_space<vmem>>, vector<1x64x256xbf16>
    %24 = vector.shape_cast %23 : vector<1x64x256xbf16> to vector<64x256xbf16>
    %cst_22 = arith.constant dense<0.000000e+00> : vector<2x256xf32>
    %25 = tpu.matmul %22, %24, %cst_22 {dimension_numbers = #tpu.dot_dimension_numbers<[1], [0], [0], [1], [0, 0, 1, 1], [], []>} : vector<2x64xbf16>, vector<64x256xbf16>, vector<2x256xf32> -> vector<2x256xf32>
    %26 = vector.extract_strided_slice %25 {offsets = [0, 0], sizes = [2, 128], strides = [1, 1]} : vector<2x256xf32> to vector<2x128xf32>
    %c1_23 = arith.constant 1 : index
    %c0_24 = arith.constant 0 : index
    %c0_25 = arith.constant 0 : index
    %27 = vector.load %arg3[%c1_23, %c0_24, %c0_25] : memref<8x2x128xf32, #tpu.memory_space<vmem>>, vector<1x2x128xf32>
    %28 = vector.shape_cast %27 : vector<1x2x128xf32> to vector<2x128xf32>
    %29 = vector.shape_cast %26 : vector<2x128xf32> to vector<1x2x128xf32>
    tpu.vector_store %arg3[%c1_23, %c0_24, %c0_25], %29 {strides = array<i32>} : memref<8x2x128xf32, #tpu.memory_space<vmem>>, vector<1x2x128xf32>,
    %30 = vector.extract_strided_slice %25 {offsets = [0, 128], sizes = [2, 128], strides = [1, 1]} : vector<2x256xf32> to vector<2x128xf32>
    %c1_26 = arith.constant 1 : index
    %c0_27 = arith.constant 0 : index
    %c0_28 = arith.constant 0 : index
    %31 = vector.load %arg4[%c1_26, %c0_27, %c0_28] : memref<8x2x128xf32, #tpu.memory_space<vmem>>, vector<1x2x128xf32>
    %32 = vector.shape_cast %31 : vector<1x2x128xf32> to vector<2x128xf32>
    %33 = vector.shape_cast %30 : vector<2x128xf32> to vector<1x2x128xf32>
    tpu.vector_store %arg4[%c1_26, %c0_27, %c0_28], %33 {strides = array<i32>} : memref<8x2x128xf32, #tpu.memory_space<vmem>>, vector<1x2x128xf32>,
    %c2 = arith.constant 2 : index
    %c0_29 = arith.constant 0 : index
    %c0_30 = arith.constant 0 : index
    %34 = vector.load %arg0[%c2, %c0_29, %c0_30] : memref<8x2x32xf32, #tpu.memory_space<vmem>>, vector<1x2x32xf32>
    %35 = vector.shape_cast %34 : vector<1x2x32xf32> to vector<2x32xf32>
    %c2_31 = arith.constant 2 : index
    %c0_32 = arith.constant 0 : index
    %c0_33 = arith.constant 0 : index
    %36 = vector.load %arg1[%c2_31, %c0_32, %c0_33] : memref<8x2x32xf32, #tpu.memory_space<vmem>>, vector<1x2x32xf32>
    %37 = vector.shape_cast %36 : vector<1x2x32xf32> to vector<2x32xf32>
    %38 = tpu.concatenate %35, %37 in 1 : vector<2x32xf32>, vector<2x32xf32> -> vector<2x64xf32>
    %39 = arith.truncf %38 : vector<2x64xf32> to vector<2x64xbf16>
    %c2_34 = arith.constant 2 : index
    %c0_35 = arith.constant 0 : index
    %c0_36 = arith.constant 0 : index
    %40 = vector.load %arg2[%c2_34, %c0_35, %c0_36] : memref<8x64x256xbf16, #tpu.memory_space<vmem>>, vector<1x64x256xbf16>
    %41 = vector.shape_cast %40 : vector<1x64x256xbf16> to vector<64x256xbf16>
    %cst_37 = arith.constant dense<0.000000e+00> : vector<2x256xf32>
    %42 = tpu.matmul %39, %41, %cst_37 {dimension_numbers = #tpu.dot_dimension_numbers<[1], [0], [0], [1], [0, 0, 1, 1], [], []>} : vector<2x64xbf16>, vector<64x256xbf16>, vector<2x256xf32> -> vector<2x256xf32>
    %43 = vector.extract_strided_slice %42 {offsets = [0, 0], sizes = [2, 128], strides = [1, 1]} : vector<2x256xf32> to vector<2x128xf32>
    %c2_38 = arith.constant 2 : index
    %c0_39 = arith.constant 0 : index
    %c0_40 = arith.constant 0 : index
    %44 = vector.load %arg3[%c2_38, %c0_39, %c0_40] : memref<8x2x128xf32, #tpu.memory_space<vmem>>, vector<1x2x128xf32>
    %45 = vector.shape_cast %44 : vector<1x2x128xf32> to vector<2x128xf32>
    %46 = vector.shape_cast %43 : vector<2x128xf32> to vector<1x2x128xf32>
    tpu.vector_store %arg3[%c2_38, %c0_39, %c0_40], %46 {strides = array<i32>} : memref<8x2x128xf32, #tpu.memory_space<vmem>>, vector<1x2x128xf32>,
    %47 = vector.extract_strided_slice %42 {offsets = [0, 128], sizes = [2, 128], strides = [1, 1]} : vector<2x256xf32> to vector<2x128xf32>
    %c2_41 = arith.constant 2 : index
    %c0_42 = arith.constant 0 : index
    %c0_43 = arith.constant 0 : index
    %48 = vector.load %arg4[%c2_41, %c0_42, %c0_43] : memref<8x2x128xf32, #tpu.memory_space<vmem>>, vector<1x2x128xf32>
    %49 = vector.shape_cast %48 : vector<1x2x128xf32> to vector<2x128xf32>
    %50 = vector.shape_cast %47 : vector<2x128xf32> to vector<1x2x128xf32>
    tpu.vector_store %arg4[%c2_41, %c0_42, %c0_43], %50 {strides = array<i32>} : memref<8x2x128xf32, #tpu.memory_space<vmem>>, vector<1x2x128xf32>,
    %c3 = arith.constant 3 : index
    %c0_44 = arith.constant 0 : index
    %c0_45 = arith.constant 0 : index
    %51 = vector.load %arg0[%c3, %c0_44, %c0_45] : memref<8x2x32xf32, #tpu.memory_space<vmem>>, vector<1x2x32xf32>
    %52 = vector.shape_cast %51 : vector<1x2x32xf32> to vector<2x32xf32>
    %c3_46 = arith.constant 3 : index
    %c0_47 = arith.constant 0 : index
    %c0_48 = arith.constant 0 : index
    %53 = vector.load %arg1[%c3_46, %c0_47, %c0_48] : memref<8x2x32xf32, #tpu.memory_space<vmem>>, vector<1x2x32xf32>
    %54 = vector.shape_cast %53 : vector<1x2x32xf32> to vector<2x32xf32>
    %55 = tpu.concatenate %52, %54 in 1 : vector<2x32xf32>, vector<2x32xf32> -> vector<2x64xf32>
    %56 = arith.truncf %55 : vector<2x64xf32> to vector<2x64xbf16>
    %c3_49 = arith.constant 3 : index
    %c0_50 = arith.constant 0 : index
    %c0_51 = arith.constant 0 : index
    %57 = vector.load %arg2[%c3_49, %c0_50, %c0_51] : memref<8x64x256xbf16, #tpu.memory_space<vmem>>, vector<1x64x256xbf16>
    %58 = vector.shape_cast %57 : vector<1x64x256xbf16> to vector<64x256xbf16>
    %cst_52 = arith.constant dense<0.000000e+00> : vector<2x256xf32>
    %59 = tpu.matmul %56, %58, %cst_52 {dimension_numbers = #tpu.dot_dimension_numbers<[1], [0], [0], [1], [0, 0, 1, 1], [], []>} : vector<2x64xbf16>, vector<64x256xbf16>, vector<2x256xf32> -> vector<2x256xf32>
    %60 = vector.extract_strided_slice %59 {offsets = [0, 0], sizes = [2, 128], strides = [1, 1]} : vector<2x256xf32> to vector<2x128xf32>
    %c3_53 = arith.constant 3 : index
    %c0_54 = arith.constant 0 : index
    %c0_55 = arith.constant 0 : index
    %61 = vector.load %arg3[%c3_53, %c0_54, %c0_55] : memref<8x2x128xf32, #tpu.memory_space<vmem>>, vector<1x2x128xf32>
    %62 = vector.shape_cast %61 : vector<1x2x128xf32> to vector<2x128xf32>
    %63 = vector.shape_cast %60 : vector<2x128xf32> to vector<1x2x128xf32>
    tpu.vector_store %arg3[%c3_53, %c0_54, %c0_55], %63 {strides = array<i32>} : memref<8x2x128xf32, #tpu.memory_space<vmem>>, vector<1x2x128xf32>,
    %64 = vector.extract_strided_slice %59 {offsets = [0, 128], sizes = [2, 128], strides = [1, 1]} : vector<2x256xf32> to vector<2x128xf32>
    %c3_56 = arith.constant 3 : index
    %c0_57 = arith.constant 0 : index
    %c0_58 = arith.constant 0 : index
    %65 = vector.load %arg4[%c3_56, %c0_57, %c0_58] : memref<8x2x128xf32, #tpu.memory_space<vmem>>, vector<1x2x128xf32>
    %66 = vector.shape_cast %65 : vector<1x2x128xf32> to vector<2x128xf32>
    %67 = vector.shape_cast %64 : vector<2x128xf32> to vector<1x2x128xf32>
    tpu.vector_store %arg4[%c3_56, %c0_57, %c0_58], %67 {strides = array<i32>} : memref<8x2x128xf32, #tpu.memory_space<vmem>>, vector<1x2x128xf32>,
    %c4 = arith.constant 4 : index
    %c0_59 = arith.constant 0 : index
    %c0_60 = arith.constant 0 : index
    %68 = vector.load %arg0[%c4, %c0_59, %c0_60] : memref<8x2x32xf32, #tpu.memory_space<vmem>>, vector<1x2x32xf32>
    %69 = vector.shape_cast %68 : vector<1x2x32xf32> to vector<2x32xf32>
    %c4_61 = arith.constant 4 : index
    %c0_62 = arith.constant 0 : index
    %c0_63 = arith.constant 0 : index
    %70 = vector.load %arg1[%c4_61, %c0_62, %c0_63] : memref<8x2x32xf32, #tpu.memory_space<vmem>>, vector<1x2x32xf32>
    %71 = vector.shape_cast %70 : vector<1x2x32xf32> to vector<2x32xf32>
    %72 = tpu.concatenate %69, %71 in 1 : vector<2x32xf32>, vector<2x32xf32> -> vector<2x64xf32>
    %73 = arith.truncf %72 : vector<2x64xf32> to vector<2x64xbf16>
    %c4_64 = arith.constant 4 : index
    %c0_65 = arith.constant 0 : index
    %c0_66 = arith.constant 0 : index
    %74 = vector.load %arg2[%c4_64, %c0_65, %c0_66] : memref<8x64x256xbf16, #tpu.memory_space<vmem>>, vector<1x64x256xbf16>
    %75 = vector.shape_cast %74 : vector<1x64x256xbf16> to vector<64x256xbf16>
    %cst_67 = arith.constant dense<0.000000e+00> : vector<2x256xf32>
    %76 = tpu.matmul %73, %75, %cst_67 {dimension_numbers = #tpu.dot_dimension_numbers<[1], [0], [0], [1], [0, 0, 1, 1], [], []>} : vector<2x64xbf16>, vector<64x256xbf16>, vector<2x256xf32> -> vector<2x256xf32>
    %77 = vector.extract_strided_slice %76 {offsets = [0, 0], sizes = [2, 128], strides = [1, 1]} : vector<2x256xf32> to vector<2x128xf32>
    %c4_68 = arith.constant 4 : index
    %c0_69 = arith.constant 0 : index
    %c0_70 = arith.constant 0 : index
    %78 = vector.load %arg3[%c4_68, %c0_69, %c0_70] : memref<8x2x128xf32, #tpu.memory_space<vmem>>, vector<1x2x128xf32>
    %79 = vector.shape_cast %78 : vector<1x2x128xf32> to vector<2x128xf32>
    %80 = vector.shape_cast %77 : vector<2x128xf32> to vector<1x2x128xf32>
    tpu.vector_store %arg3[%c4_68, %c0_69, %c0_70], %80 {strides = array<i32>} : memref<8x2x128xf32, #tpu.memory_space<vmem>>, vector<1x2x128xf32>,
    %81 = vector.extract_strided_slice %76 {offsets = [0, 128], sizes = [2, 128], strides = [1, 1]} : vector<2x256xf32> to vector<2x128xf32>
    %c4_71 = arith.constant 4 : index
    %c0_72 = arith.constant 0 : index
    %c0_73 = arith.constant 0 : index
    %82 = vector.load %arg4[%c4_71, %c0_72, %c0_73] : memref<8x2x128xf32, #tpu.memory_space<vmem>>, vector<1x2x128xf32>
    %83 = vector.shape_cast %82 : vector<1x2x128xf32> to vector<2x128xf32>
    %84 = vector.shape_cast %81 : vector<2x128xf32> to vector<1x2x128xf32>
    tpu.vector_store %arg4[%c4_71, %c0_72, %c0_73], %84 {strides = array<i32>} : memref<8x2x128xf32, #tpu.memory_space<vmem>>, vector<1x2x128xf32>,
    %c5 = arith.constant 5 : index
    %c0_74 = arith.constant 0 : index
    %c0_75 = arith.constant 0 : index
    %85 = vector.load %arg0[%c5, %c0_74, %c0_75] : memref<8x2x32xf32, #tpu.memory_space<vmem>>, vector<1x2x32xf32>
    %86 = vector.shape_cast %85 : vector<1x2x32xf32> to vector<2x32xf32>
    %c5_76 = arith.constant 5 : index
    %c0_77 = arith.constant 0 : index
    %c0_78 = arith.constant 0 : index
    %87 = vector.load %arg1[%c5_76, %c0_77, %c0_78] : memref<8x2x32xf32, #tpu.memory_space<vmem>>, vector<1x2x32xf32>
    %88 = vector.shape_cast %87 : vector<1x2x32xf32> to vector<2x32xf32>
    %89 = tpu.concatenate %86, %88 in 1 : vector<2x32xf32>, vector<2x32xf32> -> vector<2x64xf32>
    %90 = arith.truncf %89 : vector<2x64xf32> to vector<2x64xbf16>
    %c5_79 = arith.constant 5 : index
    %c0_80 = arith.constant 0 : index
    %c0_81 = arith.constant 0 : index
    %91 = vector.load %arg2[%c5_79, %c0_80, %c0_81] : memref<8x64x256xbf16, #tpu.memory_space<vmem>>, vector<1x64x256xbf16>
    %92 = vector.shape_cast %91 : vector<1x64x256xbf16> to vector<64x256xbf16>
    %cst_82 = arith.constant dense<0.000000e+00> : vector<2x256xf32>
    %93 = tpu.matmul %90, %92, %cst_82 {dimension_numbers = #tpu.dot_dimension_numbers<[1], [0], [0], [1], [0, 0, 1, 1], [], []>} : vector<2x64xbf16>, vector<64x256xbf16>, vector<2x256xf32> -> vector<2x256xf32>
    %94 = vector.extract_strided_slice %93 {offsets = [0, 0], sizes = [2, 128], strides = [1, 1]} : vector<2x256xf32> to vector<2x128xf32>
    %c5_83 = arith.constant 5 : index
    %c0_84 = arith.constant 0 : index
    %c0_85 = arith.constant 0 : index
    %95 = vector.load %arg3[%c5_83, %c0_84, %c0_85] : memref<8x2x128xf32, #tpu.memory_space<vmem>>, vector<1x2x128xf32>
    %96 = vector.shape_cast %95 : vector<1x2x128xf32> to vector<2x128xf32>
    %97 = vector.shape_cast %94 : vector<2x128xf32> to vector<1x2x128xf32>
    tpu.vector_store %arg3[%c5_83, %c0_84, %c0_85], %97 {strides = array<i32>} : memref<8x2x128xf32, #tpu.memory_space<vmem>>, vector<1x2x128xf32>,
    %98 = vector.extract_strided_slice %93 {offsets = [0, 128], sizes = [2, 128], strides = [1, 1]} : vector<2x256xf32> to vector<2x128xf32>
    %c5_86 = arith.constant 5 : index
    %c0_87 = arith.constant 0 : index
    %c0_88 = arith.constant 0 : index
    %99 = vector.load %arg4[%c5_86, %c0_87, %c0_88] : memref<8x2x128xf32, #tpu.memory_space<vmem>>, vector<1x2x128xf32>
    %100 = vector.shape_cast %99 : vector<1x2x128xf32> to vector<2x128xf32>
    %101 = vector.shape_cast %98 : vector<2x128xf32> to vector<1x2x128xf32>
    tpu.vector_store %arg4[%c5_86, %c0_87, %c0_88], %101 {strides = array<i32>} : memref<8x2x128xf32, #tpu.memory_space<vmem>>, vector<1x2x128xf32>,
    %c6 = arith.constant 6 : index
    %c0_89 = arith.constant 0 : index
    %c0_90 = arith.constant 0 : index
    %102 = vector.load %arg0[%c6, %c0_89, %c0_90] : memref<8x2x32xf32, #tpu.memory_space<vmem>>, vector<1x2x32xf32>
    %103 = vector.shape_cast %102 : vector<1x2x32xf32> to vector<2x32xf32>
    %c6_91 = arith.constant 6 : index
    %c0_92 = arith.constant 0 : index
    %c0_93 = arith.constant 0 : index
    %104 = vector.load %arg1[%c6_91, %c0_92, %c0_93] : memref<8x2x32xf32, #tpu.memory_space<vmem>>, vector<1x2x32xf32>
    %105 = vector.shape_cast %104 : vector<1x2x32xf32> to vector<2x32xf32>
    %106 = tpu.concatenate %103, %105 in 1 : vector<2x32xf32>, vector<2x32xf32> -> vector<2x64xf32>
    %107 = arith.truncf %106 : vector<2x64xf32> to vector<2x64xbf16>
    %c6_94 = arith.constant 6 : index
    %c0_95 = arith.constant 0 : index
    %c0_96 = arith.constant 0 : index
    %108 = vector.load %arg2[%c6_94, %c0_95, %c0_96] : memref<8x64x256xbf16, #tpu.memory_space<vmem>>, vector<1x64x256xbf16>
    %109 = vector.shape_cast %108 : vector<1x64x256xbf16> to vector<64x256xbf16>
    %cst_97 = arith.constant dense<0.000000e+00> : vector<2x256xf32>
    %110 = tpu.matmul %107, %109, %cst_97 {dimension_numbers = #tpu.dot_dimension_numbers<[1], [0], [0], [1], [0, 0, 1, 1], [], []>} : vector<2x64xbf16>, vector<64x256xbf16>, vector<2x256xf32> -> vector<2x256xf32>
    %111 = vector.extract_strided_slice %110 {offsets = [0, 0], sizes = [2, 128], strides = [1, 1]} : vector<2x256xf32> to vector<2x128xf32>
    %c6_98 = arith.constant 6 : index
    %c0_99 = arith.constant 0 : index
    %c0_100 = arith.constant 0 : index
    %112 = vector.load %arg3[%c6_98, %c0_99, %c0_100] : memref<8x2x128xf32, #tpu.memory_space<vmem>>, vector<1x2x128xf32>
    %113 = vector.shape_cast %112 : vector<1x2x128xf32> to vector<2x128xf32>
    %114 = vector.shape_cast %111 : vector<2x128xf32> to vector<1x2x128xf32>
    tpu.vector_store %arg3[%c6_98, %c0_99, %c0_100], %114 {strides = array<i32>} : memref<8x2x128xf32, #tpu.memory_space<vmem>>, vector<1x2x128xf32>,
    %115 = vector.extract_strided_slice %110 {offsets = [0, 128], sizes = [2, 128], strides = [1, 1]} : vector<2x256xf32> to vector<2x128xf32>
    %c6_101 = arith.constant 6 : index
    %c0_102 = arith.constant 0 : index
    %c0_103 = arith.constant 0 : index
    %116 = vector.load %arg4[%c6_101, %c0_102, %c0_103] : memref<8x2x128xf32, #tpu.memory_space<vmem>>, vector<1x2x128xf32>
    %117 = vector.shape_cast %116 : vector<1x2x128xf32> to vector<2x128xf32>
    %118 = vector.shape_cast %115 : vector<2x128xf32> to vector<1x2x128xf32>
    tpu.vector_store %arg4[%c6_101, %c0_102, %c0_103], %118 {strides = array<i32>} : memref<8x2x128xf32, #tpu.memory_space<vmem>>, vector<1x2x128xf32>,
    %c7 = arith.constant 7 : index
    %c0_104 = arith.constant 0 : index
    %c0_105 = arith.constant 0 : index
    %119 = vector.load %arg0[%c7, %c0_104, %c0_105] : memref<8x2x32xf32, #tpu.memory_space<vmem>>, vector<1x2x32xf32>
    %120 = vector.shape_cast %119 : vector<1x2x32xf32> to vector<2x32xf32>
    %c7_106 = arith.constant 7 : index
    %c0_107 = arith.constant 0 : index
    %c0_108 = arith.constant 0 : index
    %121 = vector.load %arg1[%c7_106, %c0_107, %c0_108] : memref<8x2x32xf32, #tpu.memory_space<vmem>>, vector<1x2x32xf32>
    %122 = vector.shape_cast %121 : vector<1x2x32xf32> to vector<2x32xf32>
    %123 = tpu.concatenate %120, %122 in 1 : vector<2x32xf32>, vector<2x32xf32> -> vector<2x64xf32>
    %124 = arith.truncf %123 : vector<2x64xf32> to vector<2x64xbf16>
    %c7_109 = arith.constant 7 : index
    %c0_110 = arith.constant 0 : index
    %c0_111 = arith.constant 0 : index
    %125 = vector.load %arg2[%c7_109, %c0_110, %c0_111] : memref<8x64x256xbf16, #tpu.memory_space<vmem>>, vector<1x64x256xbf16>
    %126 = vector.shape_cast %125 : vector<1x64x256xbf16> to vector<64x256xbf16>
    %cst_112 = arith.constant dense<0.000000e+00> : vector<2x256xf32>
    %127 = tpu.matmul %124, %126, %cst_112 {dimension_numbers = #tpu.dot_dimension_numbers<[1], [0], [0], [1], [0, 0, 1, 1], [], []>} : vector<2x64xbf16>, vector<64x256xbf16>, vector<2x256xf32> -> vector<2x256xf32>
    %128 = vector.extract_strided_slice %127 {offsets = [0, 0], sizes = [2, 128], strides = [1, 1]} : vector<2x256xf32> to vector<2x128xf32>
    %c7_113 = arith.constant 7 : index
    %c0_114 = arith.constant 0 : index
    %c0_115 = arith.constant 0 : index
    %129 = vector.load %arg3[%c7_113, %c0_114, %c0_115] : memref<8x2x128xf32, #tpu.memory_space<vmem>>, vector<1x2x128xf32>
    %130 = vector.shape_cast %129 : vector<1x2x128xf32> to vector<2x128xf32>
    %131 = vector.shape_cast %128 : vector<2x128xf32> to vector<1x2x128xf32>
    tpu.vector_store %arg3[%c7_113, %c0_114, %c0_115], %131 {strides = array<i32>} : memref<8x2x128xf32, #tpu.memory_space<vmem>>, vector<1x2x128xf32>,
    %132 = vector.extract_strided_slice %127 {offsets = [0, 128], sizes = [2, 128], strides = [1, 1]} : vector<2x256xf32> to vector<2x128xf32>
    %c7_116 = arith.constant 7 : index
    %c0_117 = arith.constant 0 : index
    %c0_118 = arith.constant 0 : index
    %133 = vector.load %arg4[%c7_116, %c0_117, %c0_118] : memref<8x2x128xf32, #tpu.memory_space<vmem>>, vector<1x2x128xf32>
    %134 = vector.shape_cast %133 : vector<1x2x128xf32> to vector<2x128xf32>
    %135 = vector.shape_cast %132 : vector<2x128xf32> to vector<1x2x128xf32>
    tpu.vector_store %arg4[%c7_116, %c0_117, %c0_118], %135 {strides = array<i32>} : memref<8x2x128xf32, #tpu.memory_space<vmem>>, vector<1x2x128xf32>,
    return
  }
}

</mosaic_0001>

<bundles_post_ra>
// kernel: custom-call
= control target key start
LH: loop header
LB: loop body
LE: loop exit
PB: predicated region body
PF: predicated region fallthrough
CT: control target
= control target key end

     0   :  { %s32_s0 = inlined_call_operand.vmem [shape: c64[2,8,32], index: 0, kind: input, shape index: {}]   ;;  %s33_s1 = inlined_call_operand.vmem [shape: f32[2,8,32], index: 1, kind: output, shape index: {}]  }
   0x1   :  { %v2_v0 = vld [vmem:[%s32_s0] sm:$0xff]  ;;  %v8_v1 = vld [vmem:[%s32_s0 + $0x8] sm:$0xff] }
   0x2   :  { %3 = vst [vmem:[%s33_s1] sm:$0xff] %v2_v0  ;;  %9 = vst [vmem:[%s33_s1 + $0x8] sm:$0xff] %v8_v1 }

// kernel: custom-call.1
= control target key start
LH: loop header
LB: loop body
LE: loop exit
PB: predicated region body
PF: predicated region fallthrough
CT: control target
= control target key end

     0   :  { %s35_s0 = inlined_call_operand.vmem [shape: c64[2,8,32], index: 0, kind: input, shape index: {}]   ;;  %s36_s1 = inlined_call_operand.vmem [shape: f32[2,8,32], index: 1, kind: output, shape index: {}]  }
   0x1   :  { %v10_v0 = vld [vmem:[%s35_s0 + $0x10] sm:$0xff]  ;;  %v11_v1 = vld [vmem:[%s35_s0 + $0x18] sm:$0xff] }
   0x2   :  { %4 = vst [vmem:[%s36_s1] sm:$0xff] %v10_v0  ;;  %12 = vst [vmem:[%s36_s1 + $0x8] sm:$0xff] %v11_v1 }

// kernel: custom-call.2
= control target key start
LH: loop header
LB: loop body
LE: loop exit
PB: predicated region body
PF: predicated region fallthrough
CT: control target
= control target key end

     0   :  { %s62_s0 = inlined_call_operand.vmem [shape: f32[2,8,128], index: 0, kind: input, shape index: {}]   ;;  %s63_s1 = inlined_call_operand.vmem [shape: f32[2,8,128], index: 1, kind: input, shape index: {}]   ;;  %s64_s2 = inlined_call_operand.vmem [shape: c64[2,8,128], index: 2, kind: output, shape index: {}]  }
   0x1   :  { %v5_v0 = vld [vmem:[%s62_s0] sm:$0xff]  ;;  %v18_v1 = vld [vmem:[%s62_s0 + $0x8] sm:$0xff] }
   0x2   :  { %v11_v2 = vld [vmem:[%s63_s1] sm:$0xff]  ;;  %6 = vst [vmem:[%s64_s2] sm:$0xff] %v5_v0  ;;  %19 = vst [vmem:[%s64_s2 + $0x8] sm:$0xff] %v18_v1  ;;  %v21_v3 = vld [vmem:[%s63_s1 + $0x8] sm:$0xff] }
   0x3   :  { %20 = vst [vmem:[%s64_s2 + $0x10] sm:$0xff] %v11_v2  ;;  %22 = vst [vmem:[%s64_s2 + $0x18] sm:$0xff] %v21_v3 }

// kernel: fno_forward.1
= control target key start
LH: loop header
LB: loop body
LE: loop exit
PB: predicated region body
PF: predicated region fallthrough
CT: control target
= control target key end

     0   :  { %10 = vsyncpa [#allocation3], 0  ;;  %s1136_s15 = smov [#allocation2]   ;;  %s1289_s0 = inlined_call_operand.vmem [shape: f32[8,2,32], index: 0, kind: input, shape index: {}]   ;;  %s1290_s1 = inlined_call_operand.vmem [shape: f32[8,2,32], index: 1, kind: input, shape index: {}]   ;;  %s1291_s2 = inlined_call_operand.hbm [shape: bf16[8,64,256], index: 2, kind: input, shape index: {}]   ;;  %s1292_s3 = inlined_call_operand.vmem [shape: f32[8,2,128], index: 3, kind: output, shape index: {0}]   ;;  %s1293_s4 = inlined_call_operand.vmem [shape: f32[8,2,128], index: 4, kind: output, shape index: {1}]  }
   0x1   :  { %s20_s16 = sshll.u32 %s1136_s15, 4  ;;  %s21_s16 = int_to_ptr.vmem [resolvable:$true] %s20_s16 }
   0x2   :  { %s1122_s17 = scalar_lea.vmem %s21_s16, 8192  ;;  %p1127_p1 = scmp.lt.s32.totalorder %s21_s16, %s21_s16 }
   0x3   :  { %p1123_p0 = scmp.ne.s32.totalorder %s21_s16, %s1122_s17  ;;  %p1128_p2 = scmp.lt.s32.totalorder %s1122_s17, %s1122_s17 }
   0x5   :  { %p1129_p3 = por %p1128_p2, %p1127_p1 }
   0x7   :  { %p1130_p4 = pnand %p1129_p3, %p1123_p0 }
   0x9   :  { %1133 = shalt.err (!%p1130_p4)
}
   0xa   :  { %s1137_s18 = smov 128   ;;  %s1138_s19 = smov 8  }
   0xb   :  { %26 = dma.hbm_to_vmem [thread:$0]  %s1291_s2, 8192, %s21_s16, [#allocation3], %s1137_s18, %s1137_s18, %s1138_s19  }
   0xc   :  { %1134 = dma.done.wait [#allocation3], 8192  }
   0xd   :  { %1135 = vsyncadd [#allocation3], 4294959104  ;;  %v1139_v0 = vmov 0   ;;  %v32_v1 = vld [vmem:[%s1290_s1] sm:$0x3]  ;;  %s1140_s11 = smov 32  }
   0xe   :  { %124 = vmatprep.mubr.bf16.mxu0 %v1139_v0  ;;  %229 = vmatprep.mubr.bf16.mxu1 %v1139_v0  ;;  %v903_v2 = vld [vmem:[%s1290_s1 + $0x2] sm:$0x3]  ;;  %v916_v3 = vld [vmem:[%s1290_s1 + $0x4] sm:$0x3]  ;;  %v929_v5 = vld [vmem:[%s1290_s1 + $0x6] sm:$0x3] }
   0xf   :  { %v998_v4 = vpack.i.bf16 %v903_v2, %v32_v1  ;;  %v942_v6 = vld [vmem:[%s1290_s1 + $0x8] sm:$0x3]  ;;  %v955_v7 = vld [vmem:[%s1290_s1 + $0xa] sm:$0x3]  ;;  %v968_v9 = vld [vmem:[%s1290_s1 + $0xc] sm:$0x3]  ;;  %v1003_v11 = vpack.i.bf16 %v929_v5, %v916_v3 }
  0x10   :  { %v1008_v8 = vpack.i.bf16 %v955_v7, %v942_v6  ;;  %v981_v10 = vld [vmem:[%s1290_s1 + $0xe] sm:$0x3]  ;;  %v1018_v12 = vld [vmem:[#allocation2 + $0x34] ss:$8 sps:$4 sm:$0xff]   ;;  %v1022_v15 = vld [vmem:[#allocation2 + $0x30] ss:$8 sps:$4 sm:$0xff]  }
  0x11   :  { %999 = vrot.lane.b32.xlu0 %v998_v4, %s1140_s11  ;;  %v1013_v13 = vpack.i.bf16 %v981_v10, %v968_v9  ;;  %v1020_v14 = vld [vmem:[#allocation2 + $0x74] ss:$8 sps:$4 sm:$0xff]   ;;  %100 = vmatprep.subr.bf16.mxu0 %v1018_v12  ;;  %v1023_v16 = vld [vmem:[#allocation2 + $0x70] ss:$8 sps:$4 sm:$0xff]   ;;  %v1024_v17 = vld [vmem:[#allocation2 + $0x24] ss:$8 sps:$4 sm:$0xff]  }
  0x12   :  { %1009 = vrot.lane.b32.xlu1 %v1008_v8, %s1140_s11  ;;  %205 = vmatprep.subr.bf16.mxu1 %v1020_v14  ;;  %v1026_v18 = vld [vmem:[#allocation2 + $0x64] ss:$8 sps:$4 sm:$0xff]   ;;  %v1028_v19 = vld [vmem:[#allocation2 + $0x20] ss:$8 sps:$4 sm:$0xff]   ;;  %v1030_v21 = vld [vmem:[#allocation2 + $0x14] ss:$8 sps:$4 sm:$0xff]  }
  0x13   :  { %101 = vmatpush1.bf16.msra.mxu0 %v1022_v15  ;;  %206 = vmatpush1.bf16.msra.mxu1 %v1023_v16  ;;  %v1029_v20 = vld [vmem:[#allocation2 + $0x60] ss:$8 sps:$4 sm:$0xff]   ;;  %v1032_v22 = vld [vmem:[#allocation2 + $0x54] ss:$8 sps:$4 sm:$0xff]   ;;  %v1034_v23 = vld [vmem:[#allocation2 + $0x10] ss:$8 sps:$4 sm:$0xff]  }
  0x14   :  { %102 = vmatprep.subr.bf16.mxu0 %v1024_v17  ;;  %207 = vmatprep.subr.bf16.mxu1 %v1026_v18  ;;  %v1035_v24 = vld [vmem:[#allocation2 + $0x50] ss:$8 sps:$4 sm:$0xff]   ;;  %v1036_v25 = vld [vmem:[#allocation2 + $0x4] ss:$8 sps:$4 sm:$0xff]   ;;  %v1040_v27 = vld [vmem:[#allocation2] ss:$8 sps:$4 sm:$0xff]  }
  0x15   :  { %1004 = vrot.lane.b32.xlu0 %v1003_v11, %s1140_s11  ;;  %v1038_v26 = vld [vmem:[#allocation2 + $0x44] ss:$8 sps:$4 sm:$0xff]   ;;  %v1041_v28 = vld [vmem:[#allocation2 + $0x40] ss:$8 sps:$4 sm:$0xff]   ;;  %v1044_v29 = vld [vmem:[#allocation2 + $0xb4] ss:$8 sps:$4 sm:$0xff]  }
  0x16   :  { %1014 = vrot.lane.b32.xlu1 %v1013_v13, %s1140_s11  ;;  %v1047_v30 = vld [vmem:[#allocation2 + $0xf4] ss:$8 sps:$4 sm:$0xff]   ;;  %vm37_vm0 = vcmask 261120   ;;  %v902_v31 = vld [vmem:[%s1289_s0 + $0x2] sm:$0x3]  ;;  %vm88_vm1 = vcmask 523264  }
  0x17   :  { %103 = vmatpush1.bf16.msra.mxu0 %v1028_v19  ;;  %208 = vmatpush1.bf16.msra.mxu1 %v1029_v20  ;;  %v31_v33 = vld [vmem:[%s1289_s0] sm:$0x3]  ;;  %v1042_v38 = vld [vmem:[#allocation2 + $0xb0] ss:$8 sps:$4 sm:$0xff]   ;;  %v1050_v42 = vld [vmem:[#allocation2 + $0xa4] ss:$8 sps:$4 sm:$0xff]  }
  0x18   :  { %104 = vmatprep.subr.bf16.mxu0 %v1030_v21  ;;  %209 = vmatprep.subr.bf16.mxu1 %v1032_v22  ;;  %v1045_v39 = vld [vmem:[#allocation2 + $0xf0] ss:$8 sps:$4 sm:$0xff]   ;;  %v1053_v43 = vld [vmem:[#allocation2 + $0xe4] ss:$8 sps:$4 sm:$0xff]   ;;  %v1048_v44 = vld [vmem:[#allocation2 + $0xa0] ss:$8 sps:$4 sm:$0xff]  }
  0x19   :  { %v1051_v45 = vld [vmem:[#allocation2 + $0xe0] ss:$8 sps:$4 sm:$0xff]   ;;  %v1056_v46 = vld [vmem:[#allocation2 + $0x94] ss:$8 sps:$4 sm:$0xff]   ;;  %v1054_v49 = vld [vmem:[#allocation2 + $0x90] ss:$8 sps:$4 sm:$0xff]  }
  0x1a   :  { %v1059_v47 = vld [vmem:[#allocation2 + $0xd4] ss:$8 sps:$4 sm:$0xff]   ;;  %v1057_v50 = vld [vmem:[#allocation2 + $0xd0] ss:$8 sps:$4 sm:$0xff]   ;;  %v915_v51 = vld [vmem:[%s1289_s0 + $0x4] sm:$0x3] }
  0x1b   :  { %105 = vmatpush1.bf16.msra.mxu0 %v1034_v23  ;;  %210 = vmatpush1.bf16.msra.mxu1 %v1035_v24  ;;  %v928_v54 = vld [vmem:[%s1289_s0 + $0x6] sm:$0x3]  ;;  %v1060_v59 = vld [vmem:[#allocation2 + $0x80] ss:$8 sps:$4 sm:$0xff]   ;;  %v1068_v61 = vld [vmem:[#allocation2 + $0x134] ss:$8 sps:$4 sm:$0xff]  }
  0x1c   :  { %106 = vmatprep.subr.bf16.mxu0 %v1036_v25  ;;  %211 = vmatprep.subr.bf16.mxu1 %v1038_v26  ;;  %v1062_v55 = vld [vmem:[#allocation2 + $0x84] ss:$8 sps:$4 sm:$0xff]   ;;  %v1063_v60 = vld [vmem:[#allocation2 + $0xc0] ss:$8 sps:$4 sm:$0xff]   ;;  %v1071_v62 = vld [vmem:[#allocation2 + $0x174] ss:$8 sps:$4 sm:$0xff]  }
  0x1d   :  { %v1065_v56 = vld [vmem:[#allocation2 + $0xc4] ss:$8 sps:$4 sm:$0xff]   ;;  %v1066_v2 = vld [vmem:[#allocation2 + $0x130] ss:$8 sps:$4 sm:$0xff]   ;;  %v1072_v6 = vld [vmem:[#allocation2 + $0x120] ss:$8 sps:$4 sm:$0xff]  }
  0x1e   :  { %v1069_v3 = vld [vmem:[#allocation2 + $0x170] ss:$8 sps:$4 sm:$0xff]   ;;  %v1074_v4 = vld [vmem:[#allocation2 + $0x124] ss:$8 sps:$4 sm:$0xff]   ;;  %v1075_v7 = vld [vmem:[#allocation2 + $0x160] ss:$8 sps:$4 sm:$0xff]  }
  0x1f   :  { %107 = vmatpush1.bf16.msra.mxu0 %v1040_v27  ;;  %212 = vmatpush1.bf16.msra.mxu1 %v1041_v28  ;;  %v1077_v5 = vld [vmem:[#allocation2 + $0x164] ss:$8 sps:$4 sm:$0xff]   ;;  %v1080_v8 = vld [vmem:[#allocation2 + $0x114] ss:$8 sps:$4 sm:$0xff]   ;;  %v1078_v11 = vld [vmem:[#allocation2 + $0x110] ss:$8 sps:$4 sm:$0xff]  }
  0x20   :  { %312 = vmatprep.subr.bf16.mxu0 %v1044_v29  ;;  %419 = vmatprep.subr.bf16.mxu1 %v1047_v30  ;;  %v1083_v9 = vld [vmem:[#allocation2 + $0x154] ss:$8 sps:$4 sm:$0xff]   ;;  %v1081_v12 = vld [vmem:[#allocation2 + $0x150] ss:$8 sps:$4 sm:$0xff]   ;;  %v954_v13 = vld [vmem:[%s1289_s0 + $0xa] sm:$0x3] }
  0x21   :  { %v941_v16 = vld [vmem:[%s1289_s0 + $0x8] sm:$0x3]  ;;  %v1086_v17 = vld [vmem:[#allocation2 + $0x104] ss:$8 sps:$4 sm:$0xff]   ;;  %v1092_v23 = vld [vmem:[#allocation2 + $0x1b4] ss:$8 sps:$4 sm:$0xff]  }
  0x22   :  { %v1089_v18 = vld [vmem:[#allocation2 + $0x144] ss:$8 sps:$4 sm:$0xff]   ;;  %v1084_v21 = vld [vmem:[#allocation2 + $0x100] ss:$8 sps:$4 sm:$0xff]   ;;  %v1095_v24 = vld [vmem:[#allocation2 + $0x1f4] ss:$8 sps:$4 sm:$0xff]  }
  0x23   :  { %v1087_v22 = vld [vmem:[#allocation2 + $0x140] ss:$8 sps:$4 sm:$0xff]   ;;  %v1090_v27 = vld [vmem:[#allocation2 + $0x1b0] ss:$8 sps:$4 sm:$0xff]   ;;  %v1098_v29 = vld [vmem:[#allocation2 + $0x1a4] ss:$8 sps:$4 sm:$0xff]  }
  0x24   :  { %v1093_v28 = vld [vmem:[#allocation2 + $0x1f0] ss:$8 sps:$4 sm:$0xff]   ;;  %v1101_v30 = vld [vmem:[#allocation2 + $0x1e4] ss:$8 sps:$4 sm:$0xff]  }
  0x83   :  { %v1000_v32 = vpop.permute.xlu0 %999 }
  0x84   :  { %v1002_v34 = vunpack.i.h.bf16 %v1000_v32  ;;  %v1001_v35 = vunpack.i.l.bf16 %v1000_v32  ;;  %v1010_v10 = vpop.permute.xlu1 %1009  ;;  %v1099_v32 = vld [vmem:[#allocation2 + $0x1e0] ss:$8 sps:$4 sm:$0xff]  }
  0x85   :  { %v1012_v14 = vunpack.i.h.bf16 %v1010_v10  ;;  %v1011_v15 = vunpack.i.l.bf16 %v1010_v10 }
  0x86   :  { %v143_v36 = vsel %vm37_vm0, %v902_v31, %v1002_v34  ;;  %v38_v37 = vsel %vm37_vm0, %v31_v33, %v1001_v35  ;;  %v1096_v31 = vld [vmem:[#allocation2 + $0x1a0] ss:$8 sps:$4 sm:$0xff]   ;;  %v1104_v33 = vld [vmem:[#allocation2 + $0x194] ss:$8 sps:$4 sm:$0xff]  }
  0x87   :  { %v144_v40 = vpack.c.bf16 %v143_v36, %v143_v36  ;;  %v39_v41 = vpack.c.bf16 %v38_v37, %v38_v37  ;;  %v1005_v48 = vpop.permute.xlu0 %1004  ;;  %v571_v19 = vsel %vm37_vm0, %v954_v13, %v1012_v14  ;;  %v464_v20 = vsel %vm37_vm0, %v941_v16, %v1011_v15  ;;  %v1107_v34 = vld [vmem:[#allocation2 + $0x1d4] ss:$8 sps:$4 sm:$0xff]   ;;  %v1102_v36 = vld [vmem:[#allocation2 + $0x190] ss:$8 sps:$4 sm:$0xff]  }
  0x88   :  { %v1007_v52 = vunpack.i.h.bf16 %v1005_v48  ;;  %v1006_v53 = vunpack.i.l.bf16 %v1005_v48  ;;  %v572_v25 = vpack.c.bf16 %v571_v19, %v571_v19  ;;  %v465_v26 = vpack.c.bf16 %v464_v20, %v464_v20  ;;  %v1015_v35 = vpop.permute.xlu1 %1014  ;;  %v1105_v37 = vld [vmem:[#allocation2 + $0x1d0] ss:$8 sps:$4 sm:$0xff]  }
  0x89   :  { %901 = vmatmul.mubr.msk.bf16.vlgmr.msra.gmra.mxu0 %vm88_vm1, %v39_v41  ;;  %912 = vmatmul.mubr.msk.bf16.vlgmr.msra.gmra.mxu1 %vm88_vm1, %v144_v40  ;;  %v1016_v40 = vunpack.i.l.bf16 %v1015_v35  ;;  %v980_v41 = vld [vmem:[%s1289_s0 + $0xe] sm:$0x3] }
  0x8a   :  { %313 = vmatpush1.bf16.msra.mxu0 %v1042_v38  ;;  %420 = vmatpush1.bf16.msra.mxu1 %v1045_v39  ;;  %v357_v57 = vsel %vm37_vm0, %v928_v54, %v1007_v52  ;;  %v250_v58 = vsel %vm37_vm0, %v915_v51, %v1006_v53  ;;  %v967_v38 = vld [vmem:[%s1289_s0 + $0xc] sm:$0x3]  ;;  %v1017_v39 = vunpack.i.h.bf16 %v1015_v35 }
  0x8b   :  { %314 = vmatprep.subr.bf16.mxu0 %v1050_v42  ;;  %421 = vmatprep.subr.bf16.mxu1 %v1053_v43  ;;  %v358_v63 = vpack.c.bf16 %v357_v57, %v357_v57  ;;  %v251_v1 = vpack.c.bf16 %v250_v58, %v250_v58  ;;  %v1110_v42 = vld [vmem:[#allocation2 + $0x184] ss:$8 sps:$4 sm:$0xff]  }
  0x8c   :  { %336 = vmatprep.mubr.bf16.mxu0 %v1139_v0  ;;  %443 = vmatprep.mubr.bf16.mxu1 %v1139_v0  ;;  %v1113_v43 = vld [vmem:[#allocation2 + $0x1c4] ss:$8 sps:$4 sm:$0xff]  }
  0x8e   :  { %315 = vmatpush1.bf16.msra.mxu0 %v1048_v44  ;;  %422 = vmatpush1.bf16.msra.mxu1 %v1051_v45  ;;  %v678_v44 = vsel %vm37_vm0, %v967_v38, %v1016_v40  ;;  %v1108_v45 = vld [vmem:[#allocation2 + $0x180] ss:$8 sps:$4 sm:$0xff]  }
  0x8f   :  { %316 = vmatprep.subr.bf16.mxu0 %v1056_v46  ;;  %423 = vmatprep.subr.bf16.mxu1 %v1059_v47  ;;  %v1111_v46 = vld [vmem:[#allocation2 + $0x1c0] ss:$8 sps:$4 sm:$0xff]   ;;  %v679_v48 = vpack.c.bf16 %v678_v44, %v678_v44 }
  0x92   :  { %317 = vmatpush1.bf16.msra.mxu0 %v1054_v49  ;;  %424 = vmatpush1.bf16.msra.mxu1 %v1057_v50 }
  0x93   :  { %318 = vmatprep.subr.bf16.mxu0 %v1062_v55  ;;  %425 = vmatprep.subr.bf16.mxu1 %v1065_v56 }
  0x96   :  { %319 = vmatpush1.bf16.msra.mxu0 %v1060_v59  ;;  %426 = vmatpush1.bf16.msra.mxu1 %v1063_v60 }
  0x97   :  { %526 = vmatprep.subr.bf16.mxu0 %v1068_v61  ;;  %633 = vmatprep.subr.bf16.mxu1 %v1071_v62 }
  0x99   :  { %925 = vmatmul.mubr.msk.bf16.vlgmr.msra.gmra.mxu0 %vm88_vm1, %v251_v1  ;;  %938 = vmatmul.mubr.msk.bf16.vlgmr.msra.gmra.mxu1 %vm88_vm1, %v358_v63 }
  0x9a   :  { %527 = vmatpush1.bf16.msra.mxu0 %v1066_v2  ;;  %634 = vmatpush1.bf16.msra.mxu1 %v1069_v3 }
  0x9b   :  { %528 = vmatprep.subr.bf16.mxu0 %v1074_v4  ;;  %635 = vmatprep.subr.bf16.mxu1 %v1077_v5 }
  0x9c   :  { %550 = vmatprep.mubr.bf16.mxu0 %v1139_v0  ;;  %657 = vmatprep.mubr.bf16.mxu1 %v1139_v0 }
  0x9e   :  { %529 = vmatpush1.bf16.msra.mxu0 %v1072_v6  ;;  %636 = vmatpush1.bf16.msra.mxu1 %v1075_v7 }
  0x9f   :  { %530 = vmatprep.subr.bf16.mxu0 %v1080_v8  ;;  %637 = vmatprep.subr.bf16.mxu1 %v1083_v9 }
  0xa2   :  { %531 = vmatpush1.bf16.msra.mxu0 %v1078_v11  ;;  %638 = vmatpush1.bf16.msra.mxu1 %v1081_v12 }
  0xa3   :  { %532 = vmatprep.subr.bf16.mxu0 %v1086_v17  ;;  %639 = vmatprep.subr.bf16.mxu1 %v1089_v18 }
  0xa6   :  { %533 = vmatpush1.bf16.msra.mxu0 %v1084_v21  ;;  %640 = vmatpush1.bf16.msra.mxu1 %v1087_v22 }
  0xa7   :  { %740 = vmatprep.subr.bf16.mxu0 %v1092_v23  ;;  %847 = vmatprep.subr.bf16.mxu1 %v1095_v24 }
  0xa9   :  { %951 = vmatmul.mubr.msk.bf16.vlgmr.msra.gmra.mxu0 %vm88_vm1, %v465_v26  ;;  %964 = vmatmul.mubr.msk.bf16.vlgmr.msra.gmra.mxu1 %vm88_vm1, %v572_v25 }
  0xaa   :  { %741 = vmatpush1.bf16.msra.mxu0 %v1090_v27  ;;  %848 = vmatpush1.bf16.msra.mxu1 %v1093_v28 }
  0xab   :  { %742 = vmatprep.subr.bf16.mxu0 %v1098_v29  ;;  %849 = vmatprep.subr.bf16.mxu1 %v1101_v30 }
  0xac   :  { %764 = vmatprep.mubr.bf16.mxu0 %v1139_v0  ;;  %871 = vmatprep.mubr.bf16.mxu1 %v1139_v0  ;;  %v785_v0 = vsel %vm37_vm0, %v980_v41, %v1017_v39 }
  0xad   :  { %v786_v47 = vpack.c.bf16 %v785_v0, %v785_v0 }
  0xae   :  { %743 = vmatpush1.bf16.msra.mxu0 %v1096_v31  ;;  %850 = vmatpush1.bf16.msra.mxu1 %v1099_v32 }
  0xaf   :  { %744 = vmatprep.subr.bf16.mxu0 %v1104_v33  ;;  %851 = vmatprep.subr.bf16.mxu1 %v1107_v34 }
  0xb2   :  { %745 = vmatpush1.bf16.msra.mxu0 %v1102_v36  ;;  %852 = vmatpush1.bf16.msra.mxu1 %v1105_v37 }
  0xb3   :  { %746 = vmatprep.subr.bf16.mxu0 %v1110_v42  ;;  %853 = vmatprep.subr.bf16.mxu1 %v1113_v43 }
  0xb6   :  { %747 = vmatpush1.bf16.msra.mxu0 %v1108_v45  ;;  %854 = vmatpush1.bf16.msra.mxu1 %v1111_v46 }
  0xb9   :  { %977 = vmatmul.mubr.msk.bf16.vlgmr.msra.gmra.mxu0 %vm88_vm1, %v679_v48  ;;  %990 = vmatmul.mubr.msk.bf16.vlgmr.msra.gmra.mxu1 %vm88_vm1, %v786_v47 }
 0x149   :  { %v126_v49 = vpop.f32.mrf.mxu0  ;;  %v231_v50 = vpop.f32.mrf.mxu1 }
 0x14a   :  { %133 = vst [vmem:[%s1292_s3] sm:$0x3] %v126_v49  ;;  %913 = vst [vmem:[%s1292_s3 + $0x2] sm:$0x3] %v231_v50 }
 0x14b   :  { %v128_v51 = vpop.f32.mrf.mxu0  ;;  %v233_v52 = vpop.f32.mrf.mxu1 }
 0x14c   :  { %134 = vst [vmem:[%s1293_s4] sm:$0x3] %v128_v51  ;;  %914 = vst [vmem:[%s1293_s4 + $0x2] sm:$0x3] %v233_v52 }
 0x14d   :  { %v130_v53 = vpop.f32.mrf.mxu0  ;;  %v235_v54 = vpop.f32.mrf.mxu1 }
 0x14f   :  { %v131_v55 = vpop.f32.mrf.mxu0  ;;  %v236_v56 = vpop.f32.mrf.mxu1 }
 0x159   :  { %v338_v57 = vpop.f32.mrf.mxu0  ;;  %v445_v58 = vpop.f32.mrf.mxu1 }
 0x15a   :  { %926 = vst [vmem:[%s1292_s3 + $0x4] sm:$0x3] %v338_v57  ;;  %939 = vst [vmem:[%s1292_s3 + $0x6] sm:$0x3] %v445_v58 }
 0x15b   :  { %v340_v59 = vpop.f32.mrf.mxu0  ;;  %v447_v60 = vpop.f32.mrf.mxu1 }
 0x15c   :  { %927 = vst [vmem:[%s1293_s4 + $0x4] sm:$0x3] %v340_v59  ;;  %940 = vst [vmem:[%s1293_s4 + $0x6] sm:$0x3] %v447_v60 }
 0x15d   :  { %v342_v61 = vpop.f32.mrf.mxu0  ;;  %v449_v62 = vpop.f32.mrf.mxu1 }
 0x15f   :  { %v343_v63 = vpop.f32.mrf.mxu0  ;;  %v450_v1 = vpop.f32.mrf.mxu1 }
 0x169   :  { %v552_v2 = vpop.f32.mrf.mxu0  ;;  %v659_v3 = vpop.f32.mrf.mxu1 }
 0x16a   :  { %952 = vst [vmem:[%s1292_s3 + $0x8] sm:$0x3] %v552_v2  ;;  %965 = vst [vmem:[%s1292_s3 + $0xa] sm:$0x3] %v659_v3 }
 0x16b   :  { %v554_v4 = vpop.f32.mrf.mxu0  ;;  %v661_v5 = vpop.f32.mrf.mxu1 }
 0x16c   :  { %953 = vst [vmem:[%s1293_s4 + $0x8] sm:$0x3] %v554_v4  ;;  %966 = vst [vmem:[%s1293_s4 + $0xa] sm:$0x3] %v661_v5 }
 0x16d   :  { %v556_v6 = vpop.f32.mrf.mxu0  ;;  %v663_v7 = vpop.f32.mrf.mxu1 }
 0x16f   :  { %v557_v8 = vpop.f32.mrf.mxu0  ;;  %v664_v9 = vpop.f32.mrf.mxu1 }
 0x179   :  { %v766_v10 = vpop.f32.mrf.mxu0  ;;  %v873_v11 = vpop.f32.mrf.mxu1 }
 0x17a   :  { %978 = vst [vmem:[%s1292_s3 + $0xc] sm:$0x3] %v766_v10  ;;  %991 = vst [vmem:[%s1292_s3 + $0xe] sm:$0x3] %v873_v11 }
 0x17b   :  { %v768_v12 = vpop.f32.mrf.mxu0  ;;  %v875_v13 = vpop.f32.mrf.mxu1 }
 0x17c   :  { %979 = vst [vmem:[%s1293_s4 + $0xc] sm:$0x3] %v768_v12  ;;  %992 = vst [vmem:[%s1293_s4 + $0xe] sm:$0x3] %v875_v13 }
 0x17d   :  { %v770_v14 = vpop.f32.mrf.mxu0  ;;  %v877_v15 = vpop.f32.mrf.mxu1 }
 0x17f   :  { %v771_v16 = vpop.f32.mrf.mxu0  ;;  %v878_v17 = vpop.f32.mrf.mxu1 }
 0x180   :  { %892 = vsyncpa [#allocation3], 1 }

</bundles_post_ra>
